<compile_context>
chip_gen: v7x
topology: tpu7x:2x2x1
jax: 0.10.0
libtpu: 0.0.40
codegen_flags: <defaults>
</compile_context>

<pallas_src>
import functools

import jax
import jax.numpy as jnp
from jax.experimental import pallas as pl
from jax.experimental.pallas import tpu as pltpu

_PACK = 8  # batch rows packed per 128-lane group (f32 sublane count)


# --------------------------------------------------------------------------
# Kernel
# --------------------------------------------------------------------------
def _stm_kernel(x_ref, eps_ref,
                w1_ref, b1_ref, w2_ref, b2_ref,
                wmu_ref, bmu_ref, wlv_ref, blv_ref,
                out_ref, *, minimum_std):
    def mm(a, w_ref):
        w = w_ref[...]
        if a.dtype != w.dtype:            # only cast when weights are low-precision
            a = a.astype(w.dtype)         # (keeps v5e f32 path cast-free)
        return jnp.dot(a, w, preferred_element_type=jnp.float32)

    # Packed layout: one kernel "row" carries 8 consecutive batch rows.
    h1 = jnp.maximum(mm(x_ref[...], w1_ref) + b1_ref[...], 0.0)
    h2 = jnp.maximum(mm(h1, w2_ref) + b2_ref[...], 0.0)

    # De-interleaved, block-diagonal head: mu and logvar land already in the
    # packed (rows, 8*out) layout -> the final store is fully lane-dense.
    mu = mm(h2, wmu_ref) + bmu_ref[...]
    logvar = mm(h2, wlv_ref) + blv_ref[...]

    # std = exp(logvar) + minimum_std ; next_state = eps * std + mu
    std = jnp.exp(logvar) + minimum_std
    eps = eps_ref[...].astype(jnp.float32)
    out_ref[...] = (eps * std + mu).astype(out_ref.dtype)


# --------------------------------------------------------------------------
# One-time parameter preparation (hoisted out of the per-call path)
# --------------------------------------------------------------------------
def prepare_params(params, param_dtype=jnp.float32):
    """De-interleave the (mu, logvar) head and expand every weight into 8-way
    block-diagonal form (kron(I8, W)) so the kernel can run directly on the
    lane-packed (batch/8, 8*feature) activation layout.

    Use param_dtype=jnp.bfloat16 on v6e/v7x if desired; keep f32 on v5e.
    """
    w1, b1, w2, b2, w3, b3 = params
    # reshape(-1, output, 2) semantics: even columns -> mu, odd columns -> logvar.
    w3mu, w3lv = w3[:, 0::2], w3[:, 1::2]
    b3mu, b3lv = b3[0::2], b3[1::2]

    eye = jnp.eye(_PACK, dtype=jnp.float32)
    blk = lambda w: jnp.kron(eye, w).astype(param_dtype)          # (in, out) -> (8*in, 8*out)
    tile = lambda b: jnp.tile(b, _PACK).reshape(1, -1).astype(jnp.float32)

    return (blk(w1), tile(b1), blk(w2), tile(b2),
            blk(w3mu), tile(b3mu), blk(w3lv), tile(b3lv))


# --------------------------------------------------------------------------
# Forward wrapper
# --------------------------------------------------------------------------
def stochastic_transition_forward(x, prepared_params, eps, minimum_std=0.001,
                                  block_batch=4096, stream_dtype=None):
    """Full MLP + reparameterization in a single batch-tiled Pallas kernel.

    `prepared_params` must come from `prepare_params`.  `stream_dtype` (e.g.
    jnp.bfloat16) optionally halves the streamed x/eps HBM bytes on v6e/v7x.
    """
    w1, b1, w2, b2, wmu, bmu, wlv, blv = prepared_params
    batch = x.shape[0]
    in_cols = w1.shape[0]        # 8 * input_size
    out_cols = wmu.shape[1]      # 8 * output_size
    input_size = in_cols // _PACK
    out_size = out_cols // _PACK
    assert x.shape == (batch, input_size) and eps.shape == (batch, out_size)

    if stream_dtype is not None:
        x = x.astype(stream_dtype)
        eps = eps.astype(stream_dtype)

    # Row-packing needs batch % 8 == 0; pad only the <=7 remainder rows.
    batch8 = ((batch + _PACK - 1) // _PACK) * _PACK
    if batch8 != batch:
        x = jnp.pad(x, ((0, batch8 - batch), (0, 0)))
        eps = jnp.pad(eps, ((0, batch8 - batch), (0, 0)))
    rows = batch8 // _PACK
    # Bit-identical (row-major contiguous) views -> lane-dense HBM/VMEM layout.
    x2 = x.reshape(rows, in_cols)
    eps2 = eps.reshape(rows, out_cols)

    # Packed-row tile: multiple of 8 sublanes, default 512 (= 4096 batch rows)
    # to amortize per-grid-step overhead.  If everything fits in one tile and
    # is big enough, split in two so both v7x TensorCores get a grid step.
    tr_cap = max(_PACK, ((block_batch // _PACK) // _PACK) * _PACK)
    if rows > tr_cap:
        tr = tr_cap
    elif rows >= 2 * _PACK:
        tr = ((rows + 2 * _PACK - 1) // (2 * _PACK)) * _PACK   # ~half, multiple of 8
    else:
        tr = rows                                              # tiny batch: one block
    grid = (pl.cdiv(rows, tr),)   # partial last block handled by Pallas (masked writeback)

    x_spec = pl.BlockSpec((tr, in_cols), lambda i: (i, 0))
    eps_spec = pl.BlockSpec((tr, out_cols), lambda i: (i, 0))
    out_spec = pl.BlockSpec((tr, out_cols), lambda i: (i, 0))
    const = lambda a: pl.BlockSpec(a.shape, lambda i: (0,) * a.ndim)  # VMEM-resident weights

    weights = (w1, b1, w2, b2, wmu, bmu, wlv, blv)
    flops = 2 * rows * sum(int(w.shape[0]) * int(w.shape[1]) for w in (w1, w2, wmu, wlv))
    cost = pl.CostEstimate(
        flops=int(flops),
        transcendentals=int(rows * out_cols),
        bytes_accessed=int(x2.size * x2.dtype.itemsize
                           + eps2.size * eps2.dtype.itemsize
                           + rows * out_cols * 4
                           + sum(int(w.size) * w.dtype.itemsize for w in weights)))

    kernel = functools.partial(_stm_kernel, minimum_std=minimum_std)
    out2 = pl.pallas_call(
        kernel,
        out_shape=jax.ShapeDtypeStruct((rows, out_cols), jnp.float32),
        grid=grid,
        in_specs=[x_spec, eps_spec] + [const(w) for w in weights],
        out_specs=out_spec,
        compiler_params=pltpu.CompilerParams(
            dimension_semantics=("parallel",)),
        cost_estimate=cost,
    )(x2, eps2, *weights)

    # Free reshape back to (batch, out); drop the (at most 7) pad rows.
    return out2.reshape(batch8, out_size)[:batch]


# --------------------------------------------------------------------------
# Init + pure-JAX reference
# --------------------------------------------------------------------------
def init_params(key, input_size, hidden_size, output_size):
    """Deterministic synthetic init (PyTorch Linear weight is (out,in); stored (in,out))."""
    ks = jax.random.split(key, 6)

    def lin(kw, kb, fan_in, fan_out):
        bound = 1.0 / jnp.sqrt(fan_in)
        w = jax.random.uniform(kw, (fan_in, fan_out), jnp.float32, -bound, bound)
        b = jax.random.uniform(kb, (fan_out,), jnp.float32, -bound, bound)
        return w, b

    w1, b1 = lin(ks[0], ks[1], input_size, hidden_size)
    w2, b2 = lin(ks[2], ks[3], hidden_size, hidden_size)
    w3, b3 = lin(ks[4], ks[5], hidden_size, 2 * output_size)
    return (w1, b1, w2, b2, w3, b3)


def reference_forward(x, params, eps, minimum_std=0.001):
    """Pure-JAX reference mirroring the PyTorch forward exactly."""
    w1, b1, w2, b2, w3, b3 = params
    h = jnp.maximum(x @ w1 + b1, 0.0)
    h = jnp.maximum(h @ w2 + b2, 0.0)
    flat = h @ w3 + b3
    out_size = w3.shape[1] // 2
    resh = flat.reshape(-1, out_size, 2)
    mu, logvar = resh[:, :, 0], resh[:, :, 1]
    std = jnp.exp(logvar) + minimum_std
    return eps * std + mu


# --------------------------------------------------------------------------
# Demo / self-check
# --------------------------------------------------------------------------
if __name__ == "__main__":
    input_size, hidden_size, output_size = 32, 32, 16
    batch = 8

    key = jax.random.PRNGKey(0)
    k_params, k_x, k_eps = jax.random.split(key, 3)

    params = init_params(k_params, input_size, hidden_size, output_size)
    # One-time parameter prep (hoisted out of the per-call forward path).
    prepared = prepare_params(params, param_dtype=jnp.float32)

    x = jax.random.normal(k_x, (batch, input_size), jnp.float32)
    # TODO(synk): epsilon ~ N(0,1) (torch.randn in the reference) is passed in
    # explicitly for determinism; it could be drawn in-kernel via pltpu.prng_*.
    eps = jax.random.normal(k_eps, (batch, output_size), jnp.float32)

    out = stochastic_transition_forward(x, prepared, eps)
    out = jax.block_until_ready(out)

    ref = reference_forward(x, params, eps)
    assert out.shape == (batch, output_size)
    assert jnp.allclose(out, ref, atol=1e-5, rtol=1e-5)

    print("KERNEL_OK")
</pallas_src>

<mosaic_0001>
module attributes {stable_mosaic.version = 11 : i64} {
  func.func @_stm_kernel(%arg0: i32, %arg1: memref<1x256xf32, #tpu.memory_space<vmem>>, %arg2: memref<1x128xf32, #tpu.memory_space<vmem>>, %arg3: memref<256x256xf32, #tpu.memory_space<vmem>>, %arg4: memref<1x256xf32, #tpu.memory_space<vmem>>, %arg5: memref<256x256xf32, #tpu.memory_space<vmem>>, %arg6: memref<1x256xf32, #tpu.memory_space<vmem>>, %arg7: memref<256x128xf32, #tpu.memory_space<vmem>>, %arg8: memref<1x128xf32, #tpu.memory_space<vmem>>, %arg9: memref<256x128xf32, #tpu.memory_space<vmem>>, %arg10: memref<1x128xf32, #tpu.memory_space<vmem>>, %arg11: memref<1x128xf32, #tpu.memory_space<vmem>>) attributes {dimension_semantics = [#tpu.dimension_semantics<parallel>], iteration_bounds = array<i64: 1>, scalar_prefetch = 0 : i64, scratch_operands = 0 : i64, tpu.core_type = #tpu.core_type<tc>, window_params = [{transform_indices = @transform_0, window_bounds = array<i64: 1, 256>}, {transform_indices = @transform_1, window_bounds = array<i64: 1, 128>}, {pipeline_mode = #tpu.pipeline_mode<synchronous>, transform_indices = @transform_2, window_bounds = array<i64: 256, 256>}, {pipeline_mode = #tpu.pipeline_mode<synchronous>, transform_indices = @transform_3, window_bounds = array<i64: 1, 256>}, {pipeline_mode = #tpu.pipeline_mode<synchronous>, transform_indices = @transform_4, window_bounds = array<i64: 256, 256>}, {pipeline_mode = #tpu.pipeline_mode<synchronous>, transform_indices = @transform_5, window_bounds = array<i64: 1, 256>}, {pipeline_mode = #tpu.pipeline_mode<synchronous>, transform_indices = @transform_6, window_bounds = array<i64: 256, 128>}, {pipeline_mode = #tpu.pipeline_mode<synchronous>, transform_indices = @transform_7, window_bounds = array<i64: 1, 128>}, {pipeline_mode = #tpu.pipeline_mode<synchronous>, transform_indices = @transform_8, window_bounds = array<i64: 256, 128>}, {pipeline_mode = #tpu.pipeline_mode<synchronous>, transform_indices = @transform_9, window_bounds = array<i64: 1, 128>}, {transform_indices = @transform_10, window_bounds = array<i64: 1, 128>}]} {
    %c0 = arith.constant 0 : index
    %c0_0 = arith.constant 0 : index
    %0 = vector.load %arg1[%c0, %c0_0] : memref<1x256xf32, #tpu.memory_space<vmem>>, vector<1x256xf32>
    %c0_1 = arith.constant 0 : index
    %c0_2 = arith.constant 0 : index
    %1 = vector.load %arg3[%c0_1, %c0_2] : memref<256x256xf32, #tpu.memory_space<vmem>>, vector<256x256xf32>
    %cst = arith.constant dense<0.000000e+00> : vector<1x256xf32>
    %2 = tpu.matmul %0, %1, %cst {dimension_numbers = #tpu.dot_dimension_numbers<[1], [0], [0], [1], [0, 0, 1, 1], [], []>} : vector<1x256xf32>, vector<256x256xf32>, vector<1x256xf32> -> vector<1x256xf32>
    %c0_3 = arith.constant 0 : index
    %c0_4 = arith.constant 0 : index
    %3 = vector.load %arg4[%c0_3, %c0_4] : memref<1x256xf32, #tpu.memory_space<vmem>>, vector<1x256xf32>
    %4 = arith.addf %2, %3 : vector<1x256xf32>
    %cst_5 = arith.constant 0.000000e+00 : f32
    %5 = vector.broadcast %cst_5 : f32 to vector<1x256xf32>
    %6 = arith.maximumf %4, %5 : vector<1x256xf32>
    %c0_6 = arith.constant 0 : index
    %c0_7 = arith.constant 0 : index
    %7 = vector.load %arg5[%c0_6, %c0_7] : memref<256x256xf32, #tpu.memory_space<vmem>>, vector<256x256xf32>
    %cst_8 = arith.constant dense<0.000000e+00> : vector<1x256xf32>
    %8 = tpu.matmul %6, %7, %cst_8 {dimension_numbers = #tpu.dot_dimension_numbers<[1], [0], [0], [1], [0, 0, 1, 1], [], []>} : vector<1x256xf32>, vector<256x256xf32>, vector<1x256xf32> -> vector<1x256xf32>
    %c0_9 = arith.constant 0 : index
    %c0_10 = arith.constant 0 : index
    %9 = vector.load %arg6[%c0_9, %c0_10] : memref<1x256xf32, #tpu.memory_space<vmem>>, vector<1x256xf32>
    %10 = arith.addf %8, %9 : vector<1x256xf32>
    %cst_11 = arith.constant 0.000000e+00 : f32
    %11 = vector.broadcast %cst_11 : f32 to vector<1x256xf32>
    %12 = arith.maximumf %10, %11 : vector<1x256xf32>
    %c0_12 = arith.constant 0 : index
    %c0_13 = arith.constant 0 : index
    %13 = vector.load %arg7[%c0_12, %c0_13] : memref<256x128xf32, #tpu.memory_space<vmem>>, vector<256x128xf32>
    %cst_14 = arith.constant dense<0.000000e+00> : vector<1x128xf32>
    %14 = tpu.matmul %12, %13, %cst_14 {dimension_numbers = #tpu.dot_dimension_numbers<[1], [0], [0], [1], [0, 0, 1, 1], [], []>} : vector<1x256xf32>, vector<256x128xf32>, vector<1x128xf32> -> vector<1x128xf32>
    %c0_15 = arith.constant 0 : index
    %c0_16 = arith.constant 0 : index
    %15 = vector.load %arg8[%c0_15, %c0_16] : memref<1x128xf32, #tpu.memory_space<vmem>>, vector<1x128xf32>
    %16 = arith.addf %14, %15 : vector<1x128xf32>
    %c0_17 = arith.constant 0 : index
    %c0_18 = arith.constant 0 : index
    %17 = vector.load %arg9[%c0_17, %c0_18] : memref<256x128xf32, #tpu.memory_space<vmem>>, vector<256x128xf32>
    %cst_19 = arith.constant dense<0.000000e+00> : vector<1x128xf32>
    %18 = tpu.matmul %12, %17, %cst_19 {dimension_numbers = #tpu.dot_dimension_numbers<[1], [0], [0], [1], [0, 0, 1, 1], [], []>} : vector<1x256xf32>, vector<256x128xf32>, vector<1x128xf32> -> vector<1x128xf32>
    %c0_20 = arith.constant 0 : index
    %c0_21 = arith.constant 0 : index
    %19 = vector.load %arg10[%c0_20, %c0_21] : memref<1x128xf32, #tpu.memory_space<vmem>>, vector<1x128xf32>
    %20 = arith.addf %18, %19 : vector<1x128xf32>
    %21 = math.exp %20 : vector<1x128xf32>
    %cst_22 = arith.constant 1.000000e-03 : f32
    %22 = vector.broadcast %cst_22 : f32 to vector<1x128xf32>
    %23 = arith.addf %21, %22 : vector<1x128xf32>
    %c0_23 = arith.constant 0 : index
    %c0_24 = arith.constant 0 : index
    %24 = vector.load %arg2[%c0_23, %c0_24] : memref<1x128xf32, #tpu.memory_space<vmem>>, vector<1x128xf32>
    %25 = arith.mulf %24, %23 : vector<1x128xf32>
    %26 = arith.addf %25, %16 : vector<1x128xf32>
    %c0_25 = arith.constant 0 : index
    %c0_26 = arith.constant 0 : index
    %27 = vector.load %arg11[%c0_25, %c0_26] : memref<1x128xf32, #tpu.memory_space<vmem>>, vector<1x128xf32>
    tpu.vector_store %arg11[%c0_25, %c0_26], %26 {strides = array<i32>} : memref<1x128xf32, #tpu.memory_space<vmem>>, vector<1x128xf32>,
    return
  }
  func.func @transform_0(%arg0: i32) -> (i32, i32) {
    %c0_i32 = arith.constant 0 : i32
    %c0_i32_0 = arith.constant 0 : i32
    return %arg0, %c0_i32 : i32, i32
  }
  func.func @transform_1(%arg0: i32) -> (i32, i32) {
    %c0_i32 = arith.constant 0 : i32
    %c0_i32_0 = arith.constant 0 : i32
    return %arg0, %c0_i32 : i32, i32
  }
  func.func @transform_2(%arg0: i32) -> (i32, i32) {
    %c0_i32 = arith.constant 0 : i32
    %c0_i32_0 = arith.constant 0 : i32
    %c0_i32_1 = arith.constant 0 : i32
    return %c0_i32, %c0_i32_0 : i32, i32
  }
  func.func @transform_3(%arg0: i32) -> (i32, i32) {
    %c0_i32 = arith.constant 0 : i32
    %c0_i32_0 = arith.constant 0 : i32
    %c0_i32_1 = arith.constant 0 : i32
    return %c0_i32, %c0_i32_0 : i32, i32
  }
  func.func @transform_4(%arg0: i32) -> (i32, i32) {
    %c0_i32 = arith.constant 0 : i32
    %c0_i32_0 = arith.constant 0 : i32
    %c0_i32_1 = arith.constant 0 : i32
    return %c0_i32, %c0_i32_0 : i32, i32
  }
  func.func @transform_5(%arg0: i32) -> (i32, i32) {
    %c0_i32 = arith.constant 0 : i32
    %c0_i32_0 = arith.constant 0 : i32
    %c0_i32_1 = arith.constant 0 : i32
    return %c0_i32, %c0_i32_0 : i32, i32
  }
  func.func @transform_6(%arg0: i32) -> (i32, i32) {
    %c0_i32 = arith.constant 0 : i32
    %c0_i32_0 = arith.constant 0 : i32
    %c0_i32_1 = arith.constant 0 : i32
    return %c0_i32, %c0_i32_0 : i32, i32
  }
  func.func @transform_7(%arg0: i32) -> (i32, i32) {
    %c0_i32 = arith.constant 0 : i32
    %c0_i32_0 = arith.constant 0 : i32
    %c0_i32_1 = arith.constant 0 : i32
    return %c0_i32, %c0_i32_0 : i32, i32
  }
  func.func @transform_8(%arg0: i32) -> (i32, i32) {
    %c0_i32 = arith.constant 0 : i32
    %c0_i32_0 = arith.constant 0 : i32
    %c0_i32_1 = arith.constant 0 : i32
    return %c0_i32, %c0_i32_0 : i32, i32
  }
  func.func @transform_9(%arg0: i32) -> (i32, i32) {
    %c0_i32 = arith.constant 0 : i32
    %c0_i32_0 = arith.constant 0 : i32
    %c0_i32_1 = arith.constant 0 : i32
    return %c0_i32, %c0_i32_0 : i32, i32
  }
  func.func @transform_10(%arg0: i32) -> (i32, i32) {
    %c0_i32 = arith.constant 0 : i32
    %c0_i32_0 = arith.constant 0 : i32
    return %arg0, %c0_i32 : i32, i32
  }
}

</mosaic_0001>

<bundles_post_ra>
// kernel: tpu_custom_call.1
= control target key start
LH: loop header
LB: loop body
LE: loop exit
PB: predicated region body
PF: predicated region fallthrough
CT: control target
= control target key end

     0   :  { %15 = vsyncpa [#allocation3], 0  ;;  %s1245_s0 = inlined_call_operand.hbm [shape: f32[1,256], index: 0, kind: input, shape index: {}]   ;;  %s1246_s1 = inlined_call_operand.vmem [shape: f32[1,128], index: 1, kind: input, shape index: {}]   ;;  %s1247_s2 = inlined_call_operand.hbm [shape: f32[256,256], index: 2, kind: input, shape index: {}]   ;;  %s1248_s3 = inlined_call_operand.vmem [shape: f32[1,256], index: 3, kind: input, shape index: {}]   ;;  %s1249_s4 = inlined_call_operand.hbm [shape: f32[256,256], index: 4, kind: input, shape index: {}]   ;;  %s1250_s5 = inlined_call_operand.vmem [shape: f32[1,256], index: 5, kind: input, shape index: {}]   ;;  %s1251_s6 = inlined_call_operand.hbm [shape: f32[256,128], index: 6, kind: input, shape index: {}]   ;;  %s1252_s7 = inlined_call_operand.vmem [shape: f32[1,128], index: 7, kind: input, shape index: {}]   ;;  %s1253_s8 = inlined_call_operand.hbm [shape: f32[256,128], index: 8, kind: input, shape index: {}]   ;;  %s1254_s9 = inlined_call_operand.vmem [shape: f32[1,128], index: 9, kind: input, shape index: {}]   ;;  %s1255_s10 = inlined_call_operand.hbm [shape: f32[1,128], index: 10, kind: output, shape index: {}]  }
   0x1   :  { %16 = vsyncpa [#allocation6], 0 }
   0x2   :  { %17 = vsyncpa [#allocation9], 0 }
   0x3   :  { %18 = vsyncpa [#allocation4], 0  ;;  %s1056_s13 = smov [#allocation5]   ;;  %s916_s17 = scalar_lea.hbm %s1247_s2, 8192 }
   0x4   :  { %s36_s14 = sshll.u32 %s1056_s13, 4  ;;  %p917_p0 = scmp.ne.s32.totalorder %s1247_s2, %s916_s17  ;;  %s37_s14 = int_to_ptr.vmem [resolvable:$true] %s36_s14 }
   0x5   :  { %p920_p1 = scmp.lt.u32.totalorder %s916_s17, %s1247_s2 }
   0x7   :  { %p922_p2 = pnand %p920_p1, %p917_p0 }
   0x9   :  { %925 = shalt.err (!%p922_p2)
}
   0xa   :  { %s926_s22 = scalar_lea.vmem %s37_s14, 8192  ;;  %p931_p4 = scmp.lt.s32.totalorder %s37_s14, %s37_s14 }
   0xb   :  { %p927_p3 = scmp.ne.s32.totalorder %s37_s14, %s926_s22  ;;  %p932_p5 = scmp.lt.s32.totalorder %s926_s22, %s926_s22 }
   0xd   :  { %p933_p6 = por %p932_p5, %p931_p4 }
   0xf   :  { %p934_p7 = pnand %p933_p6, %p927_p3 }
  0x11   :  { %937 = shalt.err (!%p934_p7)
}
  0x12   :  { %s1057_s23 = smov 256   ;;  %s1058_s24 = smov 16  }
  0x13   :  { %42 = dma.hbm_to_vmem [thread:$0]  %s1247_s2, 8192, %s37_s14, [#allocation6], %s1057_s23, %s1057_s23, %s1058_s24  }
  0x14   :  { %s1059_s27 = smov [#allocation8]   ;;  %s938_s11 = scalar_lea.hbm %s1251_s6, 4096 }
  0x15   :  { %s64_s28 = sshll.u32 %s1059_s27, 4  ;;  %p939_p8 = scmp.ne.s32.totalorder %s1251_s6, %s938_s11  ;;  %s65_s28 = int_to_ptr.vmem [resolvable:$true] %s64_s28 }
  0x16   :  { %p942_p9 = scmp.lt.u32.totalorder %s938_s11, %s1251_s6 }
  0x18   :  { %p944_p10 = pnand %p942_p9, %p939_p8 }
  0x1a   :  { %947 = shalt.err (!%p944_p10)
}
  0x1b   :  { %s948_s17 = scalar_lea.vmem %s65_s28, 4096  ;;  %p953_p12 = scmp.lt.s32.totalorder %s65_s28, %s65_s28 }
  0x1c   :  { %p949_p11 = scmp.ne.s32.totalorder %s65_s28, %s948_s17  ;;  %p954_p13 = scmp.lt.s32.totalorder %s948_s17, %s948_s17 }
  0x1e   :  { %p955_p0 = por %p954_p13, %p953_p12 }
  0x20   :  { %p956_p1 = pnand %p955_p0, %p949_p11 }
  0x22   :  { %959 = shalt.err (!%p956_p1)
}
  0x23   :  { %s1060_s2 = smov 128   ;;  %s1061_s14 = smov 8  }
  0x24   :  { %70 = dma.hbm_to_vmem [thread:$0]  %s1251_s6, 4096, %s65_s28, [#allocation9], %s1060_s2, %s1060_s2, %s1061_s14  }
  0x25   :  { %s1062_s20 = smov [#allocation2]   ;;  %s1063_s22 = smov [#allocation7]  }
  0x26   :  { %s25_s21 = sshll.u32 %s1062_s20, 4  ;;  %s50_s25 = sshll.u32 %s1063_s22, 4  ;;  %s26_s21 = int_to_ptr.vmem [resolvable:$true] %s25_s21  ;;  %s1151_s25 = int_to_ptr.vmem [resolvable:$true] %s50_s25 }
  0x27   :  { %s960_s29 = scalar_lea.hbm %s1245_s0, 32 }
  0x28   :  { %p961_p2 = scmp.ne.s32.totalorder %s1245_s0, %s960_s29  ;;  %p964_p3 = scmp.lt.u32.totalorder %s960_s29, %s1245_s0 }
  0x2a   :  { %p966_p4 = pnand %p964_p3, %p961_p2 }
  0x2c   :  { %969 = shalt.err (!%p966_p4)
}
  0x2d   :  { %s970_s6 = scalar_lea.vmem %s26_s21, 32  ;;  %p975_p6 = scmp.lt.s32.totalorder %s26_s21, %s26_s21 }
  0x2e   :  { %p971_p5 = scmp.ne.s32.totalorder %s26_s21, %s970_s6  ;;  %p976_p7 = scmp.lt.s32.totalorder %s970_s6, %s970_s6 }
  0x30   :  { %p977_p8 = por %p976_p7, %p975_p6 }
  0x32   :  { %p978_p9 = pnand %p977_p8, %p971_p5 }
  0x34   :  { %981 = shalt.err (!%p978_p9)
}
  0x35   :  { %28 = dma.hbm_to_vmem [thread:$0]  %s1245_s0, 32, %s26_s21, [#allocation3]  }
  0x36   :  { %s982_s18 = scalar_lea.hbm %s1249_s4, 8192 }
  0x37   :  { %p983_p10 = scmp.ne.s32.totalorder %s1249_s4, %s982_s18  ;;  %p986_p11 = scmp.lt.u32.totalorder %s982_s18, %s1249_s4 }
  0x39   :  { %p988_p12 = pnand %p986_p11, %p983_p10 }
  0x3b   :  { %991 = shalt.err (!%p988_p12)
}
  0x3c   :  { %s992_s27 = scalar_lea.vmem %s1151_s25, 8192  ;;  %p997_p0 = scmp.lt.s32.totalorder %s1151_s25, %s1151_s25 }
  0x3d   :  { %p993_p13 = scmp.ne.s32.totalorder %s1151_s25, %s992_s27  ;;  %p998_p1 = scmp.lt.s32.totalorder %s992_s27, %s992_s27 }
  0x3f   :  { %p999_p2 = por %p998_p1, %p997_p0 }
  0x41   :  { %p1000_p3 = pnand %p999_p2, %p993_p13 }
  0x43   :  { %1003 = shalt.err (!%p1000_p3)
}
  0x44   :  { %56 = dma.hbm_to_vmem [thread:$0]  %s1249_s4, 8192, %s1151_s25, [#allocation6], %s1057_s23, %s1057_s23, %s1058_s24  }
  0x45   :  { %s1064_s29 = smov [#allocation10]   ;;  %s1004_s13 = scalar_lea.hbm %s1253_s8, 4096 }
  0x46   :  { %s78_s30 = sshll.u32 %s1064_s29, 4  ;;  %p1005_p4 = scmp.ne.s32.totalorder %s1253_s8, %s1004_s13  ;;  %s79_s30 = int_to_ptr.vmem [resolvable:$true] %s78_s30 }
  0x47   :  { %p1008_p5 = scmp.lt.u32.totalorder %s1004_s13, %s1253_s8 }
  0x49   :  { %p1010_p6 = pnand %p1008_p5, %p1005_p4 }
  0x4b   :  { %1013 = shalt.err (!%p1010_p6)
}
  0x4c   :  { %s1014_s17 = scalar_lea.vmem %s79_s30, 4096  ;;  %p1019_p8 = scmp.lt.s32.totalorder %s79_s30, %s79_s30 }
  0x4d   :  { %p1015_p7 = scmp.ne.s32.totalorder %s79_s30, %s1014_s17  ;;  %p1020_p9 = scmp.lt.s32.totalorder %s1014_s17, %s1014_s17 }
  0x4f   :  { %p1021_p10 = por %p1020_p9, %p1019_p8 }
  0x51   :  { %p1022_p11 = pnand %p1021_p10, %p1015_p7 }
  0x53   :  { %1025 = shalt.err (!%p1022_p11)
}
  0x54   :  { %84 = dma.hbm_to_vmem [thread:$0]  %s1253_s8, 4096, %s79_s30, [#allocation9], %s1060_s2, %s1060_s2, %s1061_s14  }
  0x55   :  { %1048 = dma.done.wait [#allocation3], 32  }
  0x56   :  { %1049 = vsyncadd [#allocation3], 4294967264 }
  0x57   :  { %1050 = dma.done.wait [#allocation6], 16384  }
  0x58   :  { %1051 = vsyncadd [#allocation6], 4294950912 }
  0x59   :  { %1052 = dma.done.wait [#allocation9], 8192  }
  0x5a   :  { %1053 = vsyncadd [#allocation9], 4294959104  ;;  %v104_v0 = vld [vmem:[#allocation5 + $0x8] sm:$0xff]  ;;  %v106_v1 = vld [vmem:[#allocation5 + $0x18] sm:$0xff]  ;;  %v169_v25 = vlaneseq  ;;  %s1065_s22 = smov [#allocation11]  }
  0x5b   :  { %v103_v2 = vld [vmem:[#allocation5] sm:$0xff]  ;;  %v712_v3 = vpack.c.bf16 %v106_v1, %v104_v0  ;;  %v105_v4 = vld [vmem:[#allocation5 + $0x10] sm:$0xff]  ;;  %v108_v5 = vld [vmem:[#allocation5 + $0x28] sm:$0xff]  ;;  %s631_s26 = sshll.u32 %s1065_s22, 4  ;;  %s632_s26 = int_to_ptr.vmem [resolvable:$true] %s631_s26 }
  0x5c   :  { %v110_v6 = vld [vmem:[#allocation5 + $0x38] sm:$0xff]  ;;  %v714_v7 = vpack.c.bf16 %v105_v4, %v103_v2  ;;  %v107_v9 = vld [vmem:[#allocation5 + $0x20] sm:$0xff]  ;;  %v109_v10 = vld [vmem:[#allocation5 + $0x30] sm:$0xff]  ;;  %v1200_v32 = vshrl.u32 %v169_v25, 7  ;;  %s1030_s27 = scalar_lea.vmem %s632_s26, 32  ;;  %p1031_p13 = scmp.lt.s32.totalorder %s632_s26, %s632_s26 }
  0x5d   :  { %v716_v8 = vpack.c.bf16 %v110_v6, %v108_v5  ;;  %v112_v11 = vld [vmem:[#allocation5 + $0x48] sm:$0xff]  ;;  %713 = vmatprep.subr.bf16.mxu0 %v712_v3  ;;  %v114_v12 = vld [vmem:[#allocation5 + $0x58] sm:$0xff]  ;;  %v718_v13 = vpack.c.bf16 %v109_v10, %v107_v9  ;;  %v111_v15 = vld [vmem:[#allocation5 + $0x40] sm:$0xff] }
  0x5e   :  { %715 = vmatpush1.bf16.msra.mxu0 %v714_v7  ;;  %v720_v14 = vpack.c.bf16 %v114_v12, %v112_v11  ;;  %v113_v16 = vld [vmem:[#allocation5 + $0x50] sm:$0xff]  ;;  %v116_v17 = vld [vmem:[#allocation5 + $0x68] sm:$0xff]  ;;  %v118_v18 = vld [vmem:[#allocation5 + $0x78] sm:$0xff]  ;;  %v1203_v39 = vsub.s32 1, %v1200_v32 }
  0x5f   :  { %717 = vmatprep.subr.bf16.mxu0 %v716_v8  ;;  %v722_v19 = vpack.c.bf16 %v113_v16, %v111_v15  ;;  %v724_v20 = vpack.c.bf16 %v118_v18, %v116_v17  ;;  %v115_v21 = vld [vmem:[#allocation5 + $0x60] sm:$0xff]  ;;  %v117_v22 = vld [vmem:[#allocation5 + $0x70] sm:$0xff]  ;;  %v120_v23 = vld [vmem:[#allocation5 + $0x88] sm:$0xff] }
  0x60   :  { %v122_v24 = vld [vmem:[#allocation5 + $0x98] sm:$0xff]  ;;  %v726_v26 = vpack.c.bf16 %v117_v22, %v115_v21  ;;  %v119_v28 = vld [vmem:[#allocation5 + $0x80] sm:$0xff]  ;;  %v121_v29 = vld [vmem:[#allocation5 + $0x90] sm:$0xff] }
  0x61   :  { %v728_v27 = vpack.c.bf16 %v122_v24, %v120_v23  ;;  %v124_v30 = vld [vmem:[#allocation5 + $0xa8] sm:$0xff]  ;;  %v126_v31 = vld [vmem:[#allocation5 + $0xb8] sm:$0xff]  ;;  %v730_v33 = vpack.c.bf16 %v121_v29, %v119_v28  ;;  %v123_v35 = vld [vmem:[#allocation5 + $0xa0] sm:$0xff] }
  0x62   :  { %719 = vmatpush1.bf16.msra.mxu0 %v718_v13  ;;  %v732_v34 = vpack.c.bf16 %v126_v31, %v124_v30  ;;  %v125_v36 = vld [vmem:[#allocation5 + $0xb0] sm:$0xff]  ;;  %v128_v37 = vld [vmem:[#allocation5 + $0xc8] sm:$0xff]  ;;  %v130_v38 = vld [vmem:[#allocation5 + $0xd8] sm:$0xff] }
  0x63   :  { %721 = vmatprep.subr.bf16.mxu0 %v720_v14  ;;  %v734_v40 = vpack.c.bf16 %v125_v36, %v123_v35  ;;  %v127_v41 = vld [vmem:[#allocation5 + $0xc0] sm:$0xff]  ;;  %v129_v42 = vld [vmem:[#allocation5 + $0xd0] sm:$0xff]  ;;  %v132_v43 = vld [vmem:[#allocation5 + $0xe8] sm:$0xff]  ;;  %v736_v44 = vpack.c.bf16 %v130_v38, %v128_v37 }
  0x64   :  { %v134_v45 = vld [vmem:[#allocation5 + $0xf8] sm:$0xff]  ;;  %v264_v47 = vld [vmem:[#allocation7 + $0x8] sm:$0xff]  ;;  %v263_v50 = vld [vmem:[#allocation7] sm:$0xff]  ;;  %v738_v57 = vpack.c.bf16 %v129_v42, %v127_v41 }
  0x65   :  { %v1205_v46 = vld [vmem:[#allocation2] sm:$0x3]  ;;  %v265_v51 = vld [vmem:[#allocation7 + $0x10] sm:$0xff]  ;;  %v268_v54 = vld [vmem:[#allocation7 + $0x28] sm:$0xff]  ;;  %v740_v62 = vpack.c.bf16 %v134_v45, %v132_v43 }
  0x66   :  { %723 = vmatpush1.bf16.msra.mxu0 %v722_v19  ;;  %v176_v48 = vrot.slane %v1205_v46, %v1203_v39  ;;  %v266_v49 = vld [vmem:[#allocation7 + $0x18] sm:$0xff]  ;;  %v778_v53 = vpack.c.bf16 %v265_v51, %v263_v50  ;;  %v267_v56 = vld [vmem:[#allocation7 + $0x20] sm:$0xff]  ;;  %v269_v59 = vld [vmem:[#allocation7 + $0x30] sm:$0xff] }
  0x67   :  { %725 = vmatprep.subr.bf16.mxu0 %v724_v20  ;;  %v776_v52 = vpack.c.bf16 %v266_v49, %v264_v47  ;;  %v270_v55 = vld [vmem:[#allocation7 + $0x38] sm:$0xff]  ;;  %v272_v60 = vld [vmem:[#allocation7 + $0x48] sm:$0xff]  ;;  %v131_v63 = vld [vmem:[#allocation5 + $0xe0] sm:$0xff]  ;;  %v782_v3 = vpack.c.bf16 %v269_v59, %v267_v56 }
  0x68   :  { %254 = vmatprep.mubr.f32.mxu0 %v176_v48  ;;  %v780_v58 = vpack.c.bf16 %v270_v55, %v268_v54  ;;  %v274_v61 = vld [vmem:[#allocation7 + $0x58] sm:$0xff]  ;;  %v133_v0 = vld [vmem:[#allocation5 + $0xf0] sm:$0xff]  ;;  %v136_v1 = vld [vmem:[#allocation5 + $0x108] sm:$0xff] }
  0x69   :  { %777 = vmatprep.subr.bf16.mxu1 %v776_v52  ;;  %v138_v2 = vld [vmem:[#allocation5 + $0x118] sm:$0xff]  ;;  %v784_v4 = vpack.c.bf16 %v274_v61, %v272_v60  ;;  %v271_v5 = vld [vmem:[#allocation7 + $0x40] sm:$0xff]  ;;  %v273_v6 = vld [vmem:[#allocation7 + $0x50] sm:$0xff]  ;;  %v742_v7 = vpack.c.bf16 %v133_v0, %v131_v63 }
  0x6a   :  { %727 = vmatpush1.bf16.msra.mxu0 %v726_v26  ;;  %779 = vmatpush1.bf16.msra.mxu1 %v778_v53  ;;  %v276_v8 = vld [vmem:[#allocation7 + $0x68] sm:$0xff]  ;;  %v278_v9 = vld [vmem:[#allocation7 + $0x78] sm:$0xff]  ;;  %v744_v10 = vpack.c.bf16 %v138_v2, %v136_v1  ;;  %v135_v11 = vld [vmem:[#allocation5 + $0x100] sm:$0xff]  ;;  %v786_v15 = vpack.c.bf16 %v273_v6, %v271_v5 }
  0x6b   :  { %729 = vmatprep.subr.bf16.mxu0 %v728_v27  ;;  %781 = vmatprep.subr.bf16.mxu1 %v780_v58  ;;  %v137_v12 = vld [vmem:[#allocation5 + $0x110] sm:$0xff]  ;;  %v140_v13 = vld [vmem:[#allocation5 + $0x128] sm:$0xff]  ;;  %v142_v14 = vld [vmem:[#allocation5 + $0x138] sm:$0xff]  ;;  %v788_v16 = vpack.c.bf16 %v278_v9, %v276_v8 }
  0x6c   :  { %v275_v17 = vld [vmem:[#allocation7 + $0x60] sm:$0xff]  ;;  %v277_v18 = vld [vmem:[#allocation7 + $0x70] sm:$0xff]  ;;  %v746_v19 = vpack.c.bf16 %v137_v12, %v135_v11  ;;  %v280_v20 = vld [vmem:[#allocation7 + $0x88] sm:$0xff]  ;;  %v748_v22 = vpack.c.bf16 %v142_v14, %v140_v13 }
  0x6d   :  { %v282_v21 = vld [vmem:[#allocation7 + $0x98] sm:$0xff]  ;;  %v139_v23 = vld [vmem:[#allocation5 + $0x120] sm:$0xff]  ;;  %v141_v24 = vld [vmem:[#allocation5 + $0x130] sm:$0xff]  ;;  %v790_v27 = vpack.c.bf16 %v277_v18, %v275_v17 }
  0x6e   :  { %731 = vmatpush1.bf16.msra.mxu0 %v730_v33  ;;  %783 = vmatpush1.bf16.msra.mxu1 %v782_v3  ;;  %v144_v25 = vld [vmem:[#allocation5 + $0x148] sm:$0xff]  ;;  %v146_v26 = vld [vmem:[#allocation5 + $0x158] sm:$0xff]  ;;  %v792_v28 = vpack.c.bf16 %v282_v21, %v280_v20  ;;  %v279_v29 = vld [vmem:[#allocation7 + $0x80] sm:$0xff]  ;;  %v750_v31 = vpack.c.bf16 %v141_v24, %v139_v23 }
  0x6f   :  { %733 = vmatprep.subr.bf16.mxu0 %v732_v34  ;;  %785 = vmatprep.subr.bf16.mxu1 %v784_v4  ;;  %v281_v30 = vld [vmem:[#allocation7 + $0x90] sm:$0xff]  ;;  %v284_v33 = vld [vmem:[#allocation7 + $0xa8] sm:$0xff]  ;;  %v286_v34 = vld [vmem:[#allocation7 + $0xb8] sm:$0xff]  ;;  %v752_v35 = vpack.c.bf16 %v146_v26, %v144_v25 }
  0x70   :  { %v143_v36 = vld [vmem:[#allocation5 + $0x140] sm:$0xff]  ;;  %v145_v37 = vld [vmem:[#allocation5 + $0x150] sm:$0xff]  ;;  %v148_v38 = vld [vmem:[#allocation5 + $0x168] sm:$0xff]  ;;  %v794_v41 = vpack.c.bf16 %v281_v30, %v279_v29  ;;  %v796_v42 = vpack.c.bf16 %v286_v34, %v284_v33 }
  0x71   :  { %v283_v43 = vld [vmem:[#allocation7 + $0xa0] sm:$0xff]  ;;  %v754_v45 = vpack.c.bf16 %v145_v37, %v143_v36  ;;  %v288_v47 = vld [vmem:[#allocation7 + $0xc8] sm:$0xff]  ;;  %v290_v48 = vld [vmem:[#allocation7 + $0xd8] sm:$0xff] }
  0x72   :  { %735 = vmatpush1.bf16.msra.mxu0 %v734_v40  ;;  %787 = vmatpush1.bf16.msra.mxu1 %v786_v15  ;;  %v150_v40 = vld [vmem:[#allocation5 + $0x178] sm:$0xff]  ;;  %v147_v50 = vld [vmem:[#allocation5 + $0x160] sm:$0xff]  ;;  %v149_v51 = vld [vmem:[#allocation5 + $0x170] sm:$0xff]  ;;  %v800_v55 = vpack.c.bf16 %v290_v48, %v288_v47 }
  0x73   :  { %737 = vmatprep.subr.bf16.mxu0 %v736_v44  ;;  %789 = vmatprep.subr.bf16.mxu1 %v788_v16  ;;  %v285_v44 = vld [vmem:[#allocation7 + $0xb0] sm:$0xff]  ;;  %v756_v49 = vpack.c.bf16 %v150_v40, %v148_v38  ;;  %v152_v52 = vld [vmem:[#allocation5 + $0x188] sm:$0xff]  ;;  %v154_v53 = vld [vmem:[#allocation5 + $0x198] sm:$0xff]  ;;  %v758_v58 = vpack.c.bf16 %v149_v51, %v147_v50  ;;  %v1210_v38 = vsub.s32 0, %v1200_v32 }
  0x74   :  { %v798_v54 = vpack.c.bf16 %v285_v44, %v283_v43  ;;  %v287_v56 = vld [vmem:[#allocation7 + $0xc0] sm:$0xff]  ;;  %v292_v59 = vld [vmem:[#allocation7 + $0xe8] sm:$0xff]  ;;  %v294_v60 = vld [vmem:[#allocation7 + $0xf8] sm:$0xff]  ;;  %v760_v61 = vpack.c.bf16 %v154_v53, %v152_v52 }
  0x75   :  { %v153_v63 = vld [vmem:[#allocation5 + $0x190] sm:$0xff]  ;;  %v156_v0 = vld [vmem:[#allocation5 + $0x1a8] sm:$0xff]  ;;  %v158_v1 = vld [vmem:[#allocation5 + $0x1b8] sm:$0xff]  ;;  %v804_v3 = vpack.c.bf16 %v294_v60, %v292_v59  ;;  %v172_v48 = vrot.slane %v1205_v46, %v1210_v38 }
  0x76   :  { %739 = vmatpush1.bf16.msra.mxu0 %v738_v57  ;;  %791 = vmatpush1.bf16.msra.mxu1 %v790_v27  ;;  %v289_v57 = vld [vmem:[#allocation7 + $0xd0] sm:$0xff]  ;;  %v291_v4 = vld [vmem:[#allocation7 + $0xe0] sm:$0xff]  ;;  %v298_v8 = vld [vmem:[#allocation7 + $0x118] sm:$0xff]  ;;  %v764_v9 = vpack.c.bf16 %v158_v1, %v156_v0 }
  0x77   :  { %741 = vmatprep.subr.bf16.mxu0 %v740_v62  ;;  %793 = vmatprep.subr.bf16.mxu1 %v792_v28  ;;  %v151_v62 = vld [vmem:[#allocation5 + $0x180] sm:$0xff]  ;;  %v802_v2 = vpack.c.bf16 %v289_v57, %v287_v56  ;;  %v293_v5 = vld [vmem:[#allocation7 + $0xf0] sm:$0xff]  ;;  %v160_v12 = vld [vmem:[#allocation5 + $0x1c8] sm:$0xff] }
  0x78   :  { %v762_v6 = vpack.c.bf16 %v153_v63, %v151_v62  ;;  %v157_v11 = vld [vmem:[#allocation5 + $0x1b0] sm:$0xff]  ;;  %v162_v13 = vld [vmem:[#allocation5 + $0x1d8] sm:$0xff]  ;;  %v806_v14 = vpack.c.bf16 %v293_v5, %v291_v4  ;;  %v295_v16 = vld [vmem:[#allocation7 + $0x100] sm:$0xff] }
  0x79   :  { %v297_v17 = vld [vmem:[#allocation7 + $0x110] sm:$0xff]  ;;  %v302_v20 = vld [vmem:[#allocation7 + $0x138] sm:$0xff]  ;;  %v768_v21 = vpack.c.bf16 %v162_v13, %v160_v12  ;;  %v164_v24 = vld [vmem:[#allocation5 + $0x1e8] sm:$0xff] }
  0x7a   :  { %743 = vmatpush1.bf16.msra.mxu0 %v742_v7  ;;  %795 = vmatpush1.bf16.msra.mxu1 %v794_v41  ;;  %v296_v7 = vld [vmem:[#allocation7 + $0x108] sm:$0xff]  ;;  %v161_v23 = vld [vmem:[#allocation5 + $0x1d0] sm:$0xff]  ;;  %v166_v25 = vld [vmem:[#allocation5 + $0x1f8] sm:$0xff]  ;;  %v810_v26 = vpack.c.bf16 %v297_v17, %v295_v16 }
  0x7b   :  { %745 = vmatprep.subr.bf16.mxu0 %v744_v10  ;;  %797 = vmatprep.subr.bf16.mxu1 %v796_v42  ;;  %v155_v10 = vld [vmem:[#allocation5 + $0x1a0] sm:$0xff]  ;;  %v808_v15 = vpack.c.bf16 %v298_v8, %v296_v7  ;;  %v301_v29 = vld [vmem:[#allocation7 + $0x130] sm:$0xff]  ;;  %v306_v33 = vld [vmem:[#allocation7 + $0x158] sm:$0xff]  ;;  %v772_v34 = vpack.c.bf16 %v166_v25, %v164_v24 }
  0x7c   :  { %v766_v18 = vpack.c.bf16 %v157_v11, %v155_v10  ;;  %v299_v28 = vld [vmem:[#allocation7 + $0x120] sm:$0xff]  ;;  %v165_v36 = vld [vmem:[#allocation5 + $0x1f0] sm:$0xff]  ;;  %v308_v44 = vld [vmem:[#allocation7 + $0x168] sm:$0xff] }
  0x7d   :  { %v814_v37 = vpack.c.bf16 %v301_v29, %v299_v28  ;;  %v303_v41 = vld [vmem:[#allocation7 + $0x140] sm:$0xff]  ;;  %v305_v42 = vld [vmem:[#allocation7 + $0x150] sm:$0xff]  ;;  %v312_v32 = vld [vmem:[#allocation7 + $0x188] sm:$0xff] }
  0x7e   :  { %747 = vmatpush1.bf16.msra.mxu0 %v746_v19  ;;  %799 = vmatpush1.bf16.msra.mxu1 %v798_v54  ;;  %v300_v19 = vld [vmem:[#allocation7 + $0x128] sm:$0xff]  ;;  %v818_v47 = vpack.c.bf16 %v305_v42, %v303_v41  ;;  %v307_v50 = vld [vmem:[#allocation7 + $0x160] sm:$0xff]  ;;  %v309_v51 = vld [vmem:[#allocation7 + $0x170] sm:$0xff] }
  0x7f   :  { %749 = vmatprep.subr.bf16.mxu0 %v748_v22  ;;  %801 = vmatprep.subr.bf16.mxu1 %v800_v55  ;;  %v159_v22 = vld [vmem:[#allocation5 + $0x1c0] sm:$0xff]  ;;  %v812_v27 = vpack.c.bf16 %v302_v20, %v300_v19  ;;  %v314_v52 = vld [vmem:[#allocation7 + $0x198] sm:$0xff]  ;;  %v822_v53 = vpack.c.bf16 %v309_v51, %v307_v50  ;;  %v313_v56 = vld [vmem:[#allocation7 + $0x190] sm:$0xff] }
  0x80   :  { %v770_v30 = vpack.c.bf16 %v161_v23, %v159_v22  ;;  %v824_v54 = vpack.c.bf16 %v314_v52, %v312_v32  ;;  %v311_v55 = vld [vmem:[#allocation7 + $0x180] sm:$0xff]  ;;  %v316_v57 = vld [vmem:[#allocation7 + $0x1a8] sm:$0xff]  ;;  %v322_v63 = vld [vmem:[#allocation7 + $0x1d8] sm:$0xff] }
  0x81   :  { %v826_v59 = vpack.c.bf16 %v313_v56, %v311_v55  ;;  %v315_v60 = vld [vmem:[#allocation7 + $0x1a0] sm:$0xff]  ;;  %v320_v62 = vld [vmem:[#allocation7 + $0x1c8] sm:$0xff]  ;;  %v430_v20 = vld [vmem:[#allocation8 + $0x90] sm:$0xff] }
  0x82   :  { %751 = vmatpush1.bf16.msra.mxu0 %v750_v31  ;;  %803 = vmatpush1.bf16.msra.mxu1 %v802_v2  ;;  %v304_v31 = vld [vmem:[#allocation7 + $0x148] sm:$0xff]  ;;  %v832_v1 = vpack.c.bf16 %v322_v63, %v320_v62  ;;  %v319_v2 = vld [vmem:[#allocation7 + $0x1c0] sm:$0xff]  ;;  %v414_v23 = vld [vmem:[#allocation8 + $0x10] sm:$0xff] }
  0x83   :  { %753 = vmatprep.subr.bf16.mxu0 %v752_v35  ;;  %805 = vmatprep.subr.bf16.mxu1 %v804_v3  ;;  %v163_v35 = vld [vmem:[#allocation5 + $0x1e0] sm:$0xff]  ;;  %v816_v40 = vpack.c.bf16 %v306_v33, %v304_v31  ;;  %v321_v3 = vld [vmem:[#allocation7 + $0x1d0] sm:$0xff]  ;;  %v324_v5 = vld [vmem:[#allocation7 + $0x1e8] sm:$0xff] }
  0x84   :  { %v774_v43 = vpack.c.bf16 %v165_v36, %v163_v35  ;;  %v834_v4 = vpack.c.bf16 %v321_v3, %v319_v2  ;;  %v323_v8 = vld [vmem:[#allocation7 + $0x1e0] sm:$0xff]  ;;  %v429_v12 = vld [vmem:[#allocation8 + $0x88] sm:$0xff]  ;;  %v415_v24 = vld [vmem:[#allocation8 + $0x18] sm:$0xff] }
  0x85   :  { %v428_v11 = vld [vmem:[#allocation8 + $0x80] sm:$0xff]  ;;  %v413_v17 = vld [vmem:[#allocation8 + $0x8] sm:$0xff]  ;;  %v846_v25 = vpack.c.bf16 %v415_v24, %v414_v23  ;;  %v434_v33 = vld [vmem:[#allocation8 + $0xb0] sm:$0xff] }
  0x86   :  { %755 = vmatpush1.bf16.msra.mxu0 %v754_v45  ;;  %807 = vmatpush1.bf16.msra.mxu1 %v806_v14  ;;  %v310_v45 = vld [vmem:[#allocation7 + $0x178] sm:$0xff]  ;;  %v531_v13 = vld [vmem:[#allocation10 + $0x80] sm:$0xff]  ;;  %v840_v14 = vpack.c.bf16 %v429_v12, %v428_v11  ;;  %v418_v36 = vld [vmem:[#allocation8 + $0x30] sm:$0xff] }
  0x87   :  { %757 = vmatprep.subr.bf16.mxu0 %v756_v49  ;;  %809 = vmatprep.subr.bf16.mxu1 %v808_v15  ;;  %v820_v49 = vpack.c.bf16 %v310_v45, %v308_v44  ;;  %v532_v15 = vld [vmem:[#allocation10 + $0x88] sm:$0xff]  ;;  %v412_v16 = vld [vmem:[#allocation8] sm:$0xff]  ;;  %v422_v51 = vld [vmem:[#allocation8 + $0x50] sm:$0xff] }
  0x88   :  { %v842_v19 = vpack.c.bf16 %v413_v17, %v412_v16  ;;  %v416_v29 = vld [vmem:[#allocation8 + $0x20] sm:$0xff]  ;;  %v437_v42 = vld [vmem:[#allocation8 + $0xc8] sm:$0xff]  ;;  %v423_v32 = vld [vmem:[#allocation8 + $0x58] sm:$0xff] }
  0x89   :  { %v436_v41 = vld [vmem:[#allocation8 + $0xc0] sm:$0xff]  ;;  %v421_v45 = vld [vmem:[#allocation8 + $0x48] sm:$0xff]  ;;  %v862_v52 = vpack.c.bf16 %v423_v32, %v422_v51  ;;  %v167_v56 = vld [vmem:[%s1248_s3] sm:$0x3] }
  0x8a   :  { %759 = vmatpush1.bf16.msra.mxu0 %v758_v58  ;;  %811 = vmatpush1.bf16.msra.mxu1 %v810_v26  ;;  %v318_v58 = vld [vmem:[#allocation7 + $0x1b8] sm:$0xff]  ;;  %v432_v26 = vld [vmem:[#allocation8 + $0xa0] sm:$0xff]  ;;  %v516_v62 = vld [vmem:[#allocation10 + $0x8] sm:$0xff] }
  0x8b   :  { %761 = vmatprep.subr.bf16.mxu0 %v760_v61  ;;  %813 = vmatprep.subr.bf16.mxu1 %v812_v27  ;;  %v828_v46 = vpack.c.bf16 %v318_v58, %v316_v57  ;;  %v317_v61 = vld [vmem:[#allocation7 + $0x1b0] sm:$0xff]  ;;  %v433_v27 = vld [vmem:[#allocation8 + $0xa8] sm:$0xff]  ;;  %v420_v44 = vld [vmem:[#allocation8 + $0x40] sm:$0xff]  ;;  %v183_v57 = vrot.slane %v167_v56, %v1210_v38  ;;  %v187_v58 = vrot.slane %v167_v56, %v1203_v39 }
  0x8c   :  { %v830_v0 = vpack.c.bf16 %v317_v61, %v315_v60  ;;  %v848_v28 = vpack.c.bf16 %v433_v27, %v432_v26  ;;  %v515_v61 = vld [vmem:[#allocation10] sm:$0xff]  ;;  %v541_v26 = vld [vmem:[#allocation10 + $0xd0] sm:$0xff]  ;;  %v542_v27 = vld [vmem:[#allocation10 + $0xd8] sm:$0xff] }
  0x8d   :  { %v874_v3 = vpack.c.bf16 %v516_v62, %v515_v61  ;;  %v519_v12 = vld [vmem:[#allocation10 + $0x20] sm:$0xff]  ;;  %v426_v51 = vld [vmem:[#allocation8 + $0x70] sm:$0xff]  ;;  %v427_v32 = vld [vmem:[#allocation8 + $0x78] sm:$0xff] }
  0x8e   :  { %763 = vmatpush1.bf16.msra.mxu0 %v762_v6  ;;  %815 = vmatpush1.bf16.msra.mxu1 %v814_v37  ;;  %v326_v6 = vld [vmem:[#allocation7 + $0x1f8] sm:$0xff]  ;;  %v523_v24 = vld [vmem:[#allocation10 + $0x40] sm:$0xff] }
  0x8f   :  { %765 = vmatprep.subr.bf16.mxu0 %v764_v9  ;;  %817 = vmatprep.subr.bf16.mxu1 %v816_v40  ;;  %v836_v7 = vpack.c.bf16 %v326_v6, %v324_v5  ;;  %v325_v9 = vld [vmem:[#allocation7 + $0x1f0] sm:$0xff]  ;;  %v419_v37 = vld [vmem:[#allocation8 + $0x38] sm:$0xff] }
  0x90   :  { %v838_v10 = vpack.c.bf16 %v325_v9, %v323_v8  ;;  %v854_v40 = vpack.c.bf16 %v419_v37, %v418_v36  ;;  %v517_v6 = vld [vmem:[#allocation10 + $0x10] sm:$0xff]  ;;  %v535_v8 = vld [vmem:[#allocation10 + $0xa0] sm:$0xff]  ;;  %v536_v9 = vld [vmem:[#allocation10 + $0xa8] sm:$0xff] }
  0x91   :  { %v880_v11 = vpack.c.bf16 %v536_v9, %v535_v8  ;;  %v424_v37 = vld [vmem:[#allocation8 + $0x60] sm:$0xff]  ;;  %v444_v9 = vld [vmem:[%s1252_s7] sm:$0x1] }
  0x92   :  { %767 = vmatpush1.bf16.msra.mxu0 %v766_v18  ;;  %819 = vmatpush1.bf16.msra.mxu1 %v818_v47  ;;  %v872_v18 = vpack.c.bf16 %v532_v15, %v531_v13  ;;  %v858_v47 = vpack.c.bf16 %v421_v45, %v420_v44  ;;  %v520_v13 = vld [vmem:[#allocation10 + $0x28] sm:$0xff]  ;;  %v538_v15 = vld [vmem:[#allocation10 + $0xb8] sm:$0xff]  ;;  %v442_v45 = vld [vmem:[#allocation8 + $0xf0] sm:$0xff] }
  0x93   :  { %769 = vmatprep.subr.bf16.mxu0 %v768_v21  ;;  %821 = vmatprep.subr.bf16.mxu1 %v820_v49  ;;  %v431_v21 = vld [vmem:[#allocation8 + $0x98] sm:$0xff]  ;;  %v882_v16 = vpack.c.bf16 %v520_v13, %v519_v12 }
  0x94   :  { %v844_v22 = vpack.c.bf16 %v431_v21, %v430_v20  ;;  %v439_v49 = vld [vmem:[#allocation8 + $0xd8] sm:$0xff]  ;;  %v539_v20 = vld [vmem:[#allocation10 + $0xc0] sm:$0xff]  ;;  %v540_v21 = vld [vmem:[#allocation10 + $0xc8] sm:$0xff] }
  0x95   :  { %v888_v23 = vpack.c.bf16 %v540_v21, %v539_v20 }
  0x96   :  { %771 = vmatpush1.bf16.msra.mxu0 %v770_v30  ;;  %823 = vmatpush1.bf16.msra.mxu1 %v822_v53  ;;  %v417_v30 = vld [vmem:[#allocation8 + $0x28] sm:$0xff]  ;;  %v440_v53 = vld [vmem:[#allocation8 + $0xe0] sm:$0xff] }
  0x97   :  { %773 = vmatprep.subr.bf16.mxu0 %v772_v34  ;;  %825 = vmatprep.subr.bf16.mxu1 %v824_v54  ;;  %v850_v31 = vpack.c.bf16 %v417_v30, %v416_v29  ;;  %v435_v34 = vld [vmem:[#allocation8 + $0xb8] sm:$0xff]  ;;  %v441_v54 = vld [vmem:[#allocation8 + $0xe8] sm:$0xff]  ;;  %v892_v29 = vpack.c.bf16 %v542_v27, %v541_v26  ;;  %v525_v30 = vld [vmem:[#allocation10 + $0x50] sm:$0xff] }
  0x98   :  { %v852_v35 = vpack.c.bf16 %v435_v34, %v434_v33  ;;  %v864_v55 = vpack.c.bf16 %v441_v54, %v440_v53  ;;  %v543_v33 = vld [vmem:[#allocation10 + $0xe0] sm:$0xff]  ;;  %v544_v34 = vld [vmem:[#allocation10 + $0xe8] sm:$0xff]  ;;  %v870_v53 = vpack.c.bf16 %v427_v32, %v426_v51  ;;  %v529_v54 = vld [vmem:[#allocation10 + $0x70] sm:$0xff] }
  0x99   :  { %v896_v36 = vpack.c.bf16 %v544_v34, %v543_v33 }
  0x9a   :  { %775 = vmatpush1.bf16.msra.mxu0 %v774_v43  ;;  %827 = vmatpush1.bf16.msra.mxu1 %v826_v59  ;;  %v856_v43 = vpack.c.bf16 %v437_v42, %v436_v41  ;;  %v527_v41 = vld [vmem:[#allocation10 + $0x60] sm:$0xff] }
  0x9b   :  { %829 = vmatprep.subr.bf16.mxu1 %v828_v46  ;;  %841 = vmatprep.subr.bf16.mxu0 %v840_v14  ;;  %v537_v14 = vld [vmem:[#allocation10 + $0xb0] sm:$0xff] }
  0x9c   :  { %v884_v17 = vpack.c.bf16 %v538_v15, %v537_v14 }
  0x9d   :  { %255 = vmatmul.mubr.f32.vlgmr.msra.gmra.mrb[0].mxu0 %v172_v48  ;;  %v438_v48 = vld [vmem:[#allocation8 + $0xd0] sm:$0xff] }
  0x9e   :  { %831 = vmatpush1.bf16.msra.mxu1 %v830_v0  ;;  %843 = vmatpush3.bf16.msra.mxu0 %v842_v19  ;;  %v860_v50 = vpack.c.bf16 %v439_v49, %v438_v48  ;;  %v533_v0 = vld [vmem:[#allocation10 + $0x90] sm:$0xff]  ;;  %v522_v19 = vld [vmem:[#allocation10 + $0x38] sm:$0xff] }
  0x9f   :  { %833 = vmatprep.subr.bf16.mxu1 %v832_v1  ;;  %845 = vmatprep.subr.bf16.mxu0 %v844_v22  ;;  %v534_v1 = vld [vmem:[#allocation10 + $0x98] sm:$0xff]  ;;  %v545_v48 = vld [vmem:[#allocation10 + $0xf0] sm:$0xff] }
  0xa0   :  { %v876_v5 = vpack.c.bf16 %v534_v1, %v533_v0 }
  0xa2   :  { %835 = vmatpush1.bf16.msra.mxu1 %v834_v4  ;;  %847 = vmatpush3.bf16.msra.mxu0 %v846_v25  ;;  %v524_v25 = vld [vmem:[#allocation10 + $0x48] sm:$0xff] }
  0xa3   :  { %837 = vmatprep.subr.bf16.mxu1 %v836_v7  ;;  %849 = vmatprep.subr.bf16.mxu0 %v848_v28  ;;  %v518_v7 = vld [vmem:[#allocation10 + $0x18] sm:$0xff]  ;;  %v890_v28 = vpack.c.bf16 %v524_v25, %v523_v24 }
  0xa6   :  { %839 = vmatpush1.bf16.msra.mxu1 %v838_v10  ;;  %851 = vmatpush3.bf16.msra.mxu0 %v850_v31  ;;  %v878_v10 = vpack.c.bf16 %v518_v7, %v517_v6  ;;  %v526_v31 = vld [vmem:[#allocation10 + $0x58] sm:$0xff] }
  0xa7   :  { %873 = vmatprep.subr.bf16.mxu1 %v872_v18  ;;  %853 = vmatprep.subr.bf16.mxu0 %v852_v35  ;;  %v521_v18 = vld [vmem:[#allocation10 + $0x30] sm:$0xff]  ;;  %v894_v35 = vpack.c.bf16 %v526_v31, %v525_v30 }
  0xa8   :  { %v886_v22 = vpack.c.bf16 %v522_v19, %v521_v18 }
  0xaa   :  { %855 = vmatpush3.bf16.msra.mxu0 %v854_v40  ;;  %v425_v40 = vld [vmem:[#allocation8 + $0x68] sm:$0xff] }
  0xab   :  { %857 = vmatprep.subr.bf16.mxu0 %v856_v43  ;;  %v866_v42 = vpack.c.bf16 %v425_v40, %v424_v37  ;;  %v528_v43 = vld [vmem:[#allocation10 + $0x68] sm:$0xff] }
  0xac   :  { %v898_v44 = vpack.c.bf16 %v528_v43, %v527_v41 }
  0xae   :  { %859 = vmatpush3.bf16.msra.mxu0 %v858_v47  ;;  %v443_v47 = vld [vmem:[#allocation8 + $0xf8] sm:$0xff] }
  0xaf   :  { %861 = vmatprep.subr.bf16.mxu0 %v860_v50  ;;  %v868_v49 = vpack.c.bf16 %v443_v47, %v442_v45  ;;  %v546_v50 = vld [vmem:[#allocation10 + $0xf8] sm:$0xff] }
  0xb2   :  { %863 = vmatpush3.bf16.msra.mxu0 %v862_v52  ;;  %v900_v52 = vpack.c.bf16 %v546_v50, %v545_v48 }
  0xb3   :  { %865 = vmatprep.subr.bf16.mxu0 %v864_v55  ;;  %v530_v55 = vld [vmem:[#allocation10 + $0x78] sm:$0xff] }
  0xb4   :  { %v902_v56 = vpack.c.bf16 %v530_v55, %v529_v54 }
  0xb6   :  { %867 = vmatpush3.bf16.msra.mxu0 %v866_v42 }
  0xb7   :  { %869 = vmatprep.subr.bf16.mxu0 %v868_v49 }
  0xba   :  { %871 = vmatpush3.bf16.msra.mxu0 %v870_v53 }
 0x170   :  { %v256_v59 = vpop.f32.mrb[0].mxu0 }
 0x171   :  { %v257_v46 = vadd.f32 %v256_v59, %v183_v57  ;;  %v258_v60 = vpop.f32.mrb[1].mxu0  ;;  %v327_v57 = vld [vmem:[%s1250_s5] sm:$0x3] }
 0x172   :  { %v259_v63 = vadd.f32 %v258_v60, %v187_v58  ;;  %v332_v58 = vrot.slane %v327_v57, %v1210_v38  ;;  %v336_v59 = vrot.slane %v327_v57, %v1203_v39 }
 0x173   :  { %v261_v4 = vmax.f32 %v257_v46, 0.0 }
 0x174   :  { %v262_v2 = vmax.f32 %v259_v63, 0.0 }
 0x176   :  { %403 = vmatprep.mubr.f32.mxu1 %v262_v2 }
 0x177   :  { %404 = vmatmul.mubr.f32.vlgmr.msra.gmra.mrb[0].mxu1 %v261_v4  ;;  %v547_v4 = vld [vmem:[%s1254_s9] sm:$0x1]  ;;  %s1026_s9 = scalar_lea.vmem %s632_s26, 16 }
 0x178   :  { %875 = vmatpush3.bf16.msra.mxu1 %v874_v3  ;;  %p1027_p12 = scmp.ne.s32.totalorder %s632_s26, %s1026_s9  ;;  %p1032_p0 = scmp.lt.s32.totalorder %s1030_s27, %s1026_s9 }
 0x179   :  { %877 = vmatprep.subr.bf16.mxu1 %v876_v5 }
 0x17a   :  { %p1033_p1 = por %p1032_p0, %p1031_p13 }
 0x17c   :  { %879 = vmatpush3.bf16.msra.mxu1 %v878_v10  ;;  %v621_v10 = vld [vmem:[%s1246_s1] sm:$0x1]  ;;  %p1034_p2 = pnand %p1033_p1, %p1027_p12 }
 0x17d   :  { %881 = vmatprep.subr.bf16.mxu1 %v880_v11 }
 0x180   :  { %883 = vmatpush3.bf16.msra.mxu1 %v882_v16 }
 0x181   :  { %885 = vmatprep.subr.bf16.mxu1 %v884_v17 }
 0x184   :  { %887 = vmatpush3.bf16.msra.mxu1 %v886_v22 }
 0x185   :  { %889 = vmatprep.subr.bf16.mxu1 %v888_v23 }
 0x188   :  { %891 = vmatpush3.bf16.msra.mxu1 %v890_v28 }
 0x189   :  { %893 = vmatprep.subr.bf16.mxu1 %v892_v29 }
 0x18c   :  { %895 = vmatpush3.bf16.msra.mxu1 %v894_v35 }
 0x18d   :  { %897 = vmatprep.subr.bf16.mxu1 %v896_v36 }
 0x190   :  { %899 = vmatpush3.bf16.msra.mxu1 %v898_v44 }
 0x191   :  { %901 = vmatprep.subr.bf16.mxu1 %v900_v52 }
 0x194   :  { %903 = vmatpush3.bf16.msra.mxu1 %v902_v56 }
 0x24a   :  { %v405_v46 = vpop.f32.mrb[0].mxu1 }
 0x24b   :  { %v406_v60 = vadd.f32 %v405_v46, %v332_v58  ;;  %v407_v61 = vpop.f32.mrb[1].mxu1 }
 0x24c   :  { %v408_v62 = vadd.f32 %v407_v61, %v336_v59 }
 0x24d   :  { %v410_v0 = vmax.f32 %v406_v60, 0.0 }
 0x24e   :  { %v411_v63 = vmax.f32 %v408_v62, 0.0 }
 0x250   :  { %509 = vmatprep.mubr.f32.mxu0 %v411_v63  ;;  %612 = vmatprep.mubr.f32.mxu1 %v411_v63 }
 0x251   :  { %510 = vmatmul.mubr.f32.vlgmr.msra.gmra.mrb[2].mxu0 %v410_v0  ;;  %613 = vmatmul.mubr.f32.vlgmr.msra.gmra.mrb[2].mxu1 %v410_v0 }
 0x324   :  { %v674_v1 = vpop.f32.mrb[2].mxu0  ;;  %v709_v2 = vpop.f32.mrb[2].mxu1 }
 0x325   :  { %v675_v3 = vpop.f32.mrb[3].mxu0  ;;  %v710_v38 = vpop.f32.mrb[3].mxu1 }
 0x326   :  { %v676_v5 = vadd.f32 %v675_v3, %v674_v1  ;;  %v711_v39 = vadd.f32 %v710_v38, %v709_v2 }
 0x328   :  { %v615_v6 = vadd.f32 %v711_v39, %v547_v4  ;;  %v512_v12 = vadd.f32 %v676_v5, %v444_v9 }
 0x32a   :  { %v618_v7 = vmul.f32 1.442695, %v615_v6 }
 0x32c   :  { %914 = vpow2.f32 %v618_v7 }
 0x336   :  { %v915_v8 = vpop.eup %914 }
 0x337   :  { %v620_v11 = vadd.f32 0.001, %v915_v8 }
 0x339   :  { %v622_v13 = vmul.f32 %v621_v10, %v620_v11 }
 0x33b   :  { %v623_v14 = vadd.f32 %v622_v13, %v512_v12 }
 0x33d   :  { %624 = vst [vmem:[#allocation11] sm:$0x1] %v623_v14 }
 0x33e   :  { %1037 = shalt.err (!%p1034_p2)
}
 0x33f   :  { %s1038_s1 = scalar_lea.hbm %s1255_s10, 16 }
 0x340   :  { %p1039_p3 = scmp.ne.s32.totalorder %s1255_s10, %s1038_s1  ;;  %p1042_p4 = scmp.lt.u32.totalorder %s1038_s1, %s1255_s10 }
 0x342   :  { %p1044_p5 = pnand %p1042_p4, %p1039_p3 }
 0x344   :  { %1047 = shalt.err (!%p1044_p5)
}
 0x345   :  { %634 = dma.vmem_to_hbm [thread:$0]  %s632_s26, 16, %s1255_s10, [#allocation4]  }
 0x346   :  { %1054 = dma.done.wait [#allocation4], 16  }
 0x347   :  { %1055 = vsyncadd [#allocation4], 4294967280 }
 0x348   :  { %638 = vsyncpa [#allocation3], 1 }
 0x349   :  { %639 = vsyncpa [#allocation6], 1 }
 0x34a   :  { %640 = vsyncpa [#allocation9], 1 }
 0x34b   :  { %641 = vsyncpa [#allocation4], 1 }

</bundles_post_ra>
